<compile_context>
chip_gen: v6e
topology: v6e:2x2x1
jax: 0.10.0
libtpu: 0.0.40
codegen_flags: <defaults>
</compile_context>

<pallas_src>
import functools

import jax
import jax.numpy as jnp
from jax.experimental import pallas as pl
from jax.experimental.pallas import tpu as pltpu

LANE = 128
SUBLANE = 8
BN_EPS = 1e-5
MAX_TB = 1024          # max batch-tile rows
PALLAS_MIN_BATCH = 256  # below this, plain XLA dots win (launch overhead)


def _round_up(n, m):
    return ((n + m - 1) // m) * m


@functools.lru_cache(maxsize=1)
def _num_tensorcores_per_chip():
    """Best-effort TC-per-chip query (v7x has 2). Falls back to 1."""
    try:
        return max(1, int(getattr(jax.devices()[0], "num_cores", 1) or 1))
    except Exception:
        return 1


def _pick_batch_tile(batch, n_tc):
    """Big tiles (per-step overhead ~0.35us >> work per 128-row step); on
    multi-TC chips make sure the parallel axis has >= n_tc steps once the
    batch is large enough to be worth splitting across cores."""
    b8 = _round_up(batch, SUBLANE)
    tb = min(MAX_TB, b8)
    if n_tc > 1 and b8 >= 512:
        tb = min(tb, _round_up(-(-b8 // n_tc), SUBLANE))
    return tb


# ----------------------------------------------------------------------------
# Pallas kernel: entire MLP stack, fully unrolled, one batch tile per grid step
# ----------------------------------------------------------------------------
def _fused_mlp_kernel(x_ref, *refs):
    """refs = (w_0, b_0, w_1, b_1, ..., o_ref). Weights/biases use a constant
    index_map so they stay VMEM-resident across batch tiles. Intermediates
    live in vregs (no scratch, no HBM round-trips)."""
    o_ref = refs[-1]
    wb_refs = refs[:-1]
    n_layers = len(wb_refs) // 2

    h = x_ref[...]
    for i in range(n_layers):
        w = wb_refs[2 * i][...]
        b = wb_refs[2 * i + 1][...]
        # Linear on the MXU (f32 accumulate) + bias + ReLU on the VPU.
        h = jnp.maximum(
            jnp.dot(h, w, preferred_element_type=jnp.float32) + b, 0.0
        )
    o_ref[...] = h.astype(o_ref.dtype)


# ----------------------------------------------------------------------------
# Build-time: fold BN into Linear, pad ONLY the final layer's columns to 128
# (lane-dense output store). Done ONCE, cached alongside the model.
# ----------------------------------------------------------------------------
def fold_and_pad_params(params):
    n = len(params)
    out = []
    for i, (w, b, gamma, beta, rm, rv) in enumerate(params):
        scale = gamma * jax.lax.rsqrt(rv + BN_EPS)            # (1, Cout)
        w_f = (w * scale).astype(jnp.float32)                  # W'
        b_f = ((b - rm) * scale + beta).astype(jnp.float32)    # b'
        if i == n - 1:
            cout = w.shape[1]
            cpad = _round_up(cout, LANE)
            if cpad != cout:
                # Zero-padded output columns give relu(0 + 0) = 0; sliced off
                # in the wrapper, so exact.
                w_f = jnp.pad(w_f, ((0, 0), (0, cpad - cout)))
                b_f = jnp.pad(b_f, ((0, 0), (0, cpad - cout)))
        out.extend([w_f, b_f])
    # TODO(synk): for deep stacks, pack the per-layer biases into a single
    #             (n_layers, width) operand to cut per-operand pipeline
    #             bookkeeping; negligible at 2 layers.
    return tuple(out)


# ----------------------------------------------------------------------------
# Hot path: pad batch axis of x, launch ONE pallas_call for the whole stack.
# ----------------------------------------------------------------------------
@functools.partial(jax.jit, static_argnames=("f_out", "force_pallas"))
def enhanced_base_model_forward(x, padded_wb, *, f_out, force_pallas=False):
    batch, f_in = x.shape
    x = x.astype(jnp.float32)
    n_layers = len(padded_wb) // 2
    out_pad = padded_wb[-1].shape[1]

    # --- Small-batch fast path: custom-call launch > compute at these sizes. ---
    if batch < PALLAS_MIN_BATCH and not force_pallas:
        h = x
        for i in range(n_layers):
            h = jnp.maximum(jnp.dot(h, padded_wb[2 * i]) + padded_wb[2 * i + 1], 0.0)
        return h[:, :f_out]

    # --- Batch tiling (generation-aware). ---
    n_tc = _num_tensorcores_per_chip()
    tb = _pick_batch_tile(batch, n_tc)
    batch_pad = _round_up(batch, tb)
    grid = (batch_pad // tb,)

    x_p = x if batch_pad == batch else jnp.pad(x, ((0, batch_pad - batch), (0, 0)))

    # --- VMEM budget guard (v7x has 64 MiB vs 128 MiB on v5e/v6e). ---
    weight_bytes = sum(int(a.size) * a.dtype.itemsize for a in padded_wb)
    io_bytes = (tb * f_in + tb * out_pad) * 4
    vmem_needed = 2 * (weight_bytes + io_bytes) + (1 << 20)   # double-buffers + slack
    vmem_limit = int(min(max(vmem_needed, 32 << 20), 64 << 20))

    # x: batch-tiled, feature dim left at its natural (full-array) size.
    in_specs = [pl.BlockSpec((tb, f_in), lambda i: (i, 0))]
    for arr in padded_wb:
        # Constant index_map -> weights/biases VMEM-resident across batch tiles.
        in_specs.append(pl.BlockSpec(tuple(arr.shape), lambda i: (0, 0)))

    out_p = pl.pallas_call(
        _fused_mlp_kernel,
        out_shape=jax.ShapeDtypeStruct((batch_pad, out_pad), jnp.float32),
        grid=grid,
        in_specs=in_specs,
        out_specs=pl.BlockSpec((tb, out_pad), lambda i: (i, 0)),
        compiler_params=pltpu.CompilerParams(
            dimension_semantics=("parallel",),     # shards batch tiles on v7x
            vmem_limit_bytes=vmem_limit,
        ),
    )(x_p, *padded_wb)

    return out_p[:batch, :f_out]


# ----------------------------------------------------------------------------
# Parameters: one tuple per (Linear, BatchNorm1d, ReLU, Dropout) block,
# PyTorch-default initialization.
# ----------------------------------------------------------------------------
def build_params(hidden_sizes, key):
    params = []
    prev = hidden_sizes[0]
    for size in hidden_sizes[1:]:
        key, wk, bk = jax.random.split(key, 3)
        bound = 1.0 / jnp.sqrt(prev)  # nn.Linear default: U(-1/sqrt(fan_in), ...)
        w = jax.random.uniform(wk, (prev, size), jnp.float32, -bound, bound)
        b = jax.random.uniform(bk, (1, size), jnp.float32, -bound, bound)
        gamma = jnp.ones((1, size), jnp.float32)          # BatchNorm1d defaults
        beta = jnp.zeros((1, size), jnp.float32)
        running_mean = jnp.zeros((1, size), jnp.float32)
        running_var = jnp.ones((1, size), jnp.float32)
        params.append((w, b, gamma, beta, running_mean, running_var))
        prev = size
    return params


# Pure-JAX reference (original, unfolded math) for a sanity check.
def _reference_forward(x, params):
    for (w, b, gamma, beta, rm, rv) in params:
        y = x @ w + b
        y = (y - rm) / jnp.sqrt(rv + BN_EPS) * gamma + beta
        x = jnp.maximum(y, 0.0)
    return x


if __name__ == "__main__":
    # ModelConfig(model_type="mlp", hidden_sizes=[32, 64, 32], dropout_rate=0.1, lr=1e-3)
    hidden_sizes = [32, 64, 32]
    batch = 8

    key = jax.random.PRNGKey(0)
    key, xk, pk = jax.random.split(key, 3)
    x = jax.random.normal(xk, (batch, hidden_sizes[0]), jnp.float32)
    params = build_params(hidden_sizes, pk)

    # Hoisted (build-time, once): BN fold + last-layer lane padding.
    padded_wb = fold_and_pad_params(params)
    f_out = hidden_sizes[-1]

    # Pallas path (forced so the kernel is exercised even at this tiny batch).
    out = enhanced_base_model_forward(x, padded_wb, f_out=f_out, force_pallas=True)
    out = jax.block_until_ready(out)

    ref = _reference_forward(x, params)
    assert out.shape == (batch, f_out)
    assert jnp.allclose(out, ref, atol=1e-4, rtol=1e-4), "pallas path mismatch"

    # Small-batch fast path (same folded weights) should match too.
    out_fast = jax.block_until_ready(
        enhanced_base_model_forward(x, padded_wb, f_out=f_out))
    assert jnp.allclose(out_fast, ref, atol=1e-4, rtol=1e-4), "fast path mismatch"

    print("KERNEL_OK")
</pallas_src>

<mosaic_0001>
module attributes {stable_mosaic.version = 11 : i64} {
  func.func @_fused_mlp_kernel(%arg0: i32, %arg1: memref<8x32xf32, #tpu.memory_space<vmem>>, %arg2: memref<32x64xf32, #tpu.memory_space<vmem>>, %arg3: memref<1x64xf32, #tpu.memory_space<vmem>>, %arg4: memref<64x128xf32, #tpu.memory_space<vmem>>, %arg5: memref<1x128xf32, #tpu.memory_space<vmem>>, %arg6: memref<8x128xf32, #tpu.memory_space<vmem>>) attributes {dimension_semantics = [#tpu.dimension_semantics<parallel>], iteration_bounds = array<i64: 1>, scalar_prefetch = 0 : i64, scratch_operands = 0 : i64, tpu.core_type = #tpu.core_type<tc>, window_params = [{transform_indices = @transform_0, window_bounds = array<i64: 8, 32>}, {pipeline_mode = #tpu.pipeline_mode<synchronous>, transform_indices = @transform_1, window_bounds = array<i64: 32, 64>}, {pipeline_mode = #tpu.pipeline_mode<synchronous>, transform_indices = @transform_2, window_bounds = array<i64: 1, 64>}, {pipeline_mode = #tpu.pipeline_mode<synchronous>, transform_indices = @transform_3, window_bounds = array<i64: 64, 128>}, {pipeline_mode = #tpu.pipeline_mode<synchronous>, transform_indices = @transform_4, window_bounds = array<i64: 1, 128>}, {transform_indices = @transform_5, window_bounds = array<i64: 8, 128>}]} {
    %c0 = arith.constant 0 : index
    %c0_0 = arith.constant 0 : index
    %0 = vector.load %arg1[%c0, %c0_0] : memref<8x32xf32, #tpu.memory_space<vmem>>, vector<8x32xf32>
    %c0_1 = arith.constant 0 : index
    %c0_2 = arith.constant 0 : index
    %1 = vector.load %arg2[%c0_1, %c0_2] : memref<32x64xf32, #tpu.memory_space<vmem>>, vector<32x64xf32>
    %c0_3 = arith.constant 0 : index
    %c0_4 = arith.constant 0 : index
    %2 = vector.load %arg3[%c0_3, %c0_4] : memref<1x64xf32, #tpu.memory_space<vmem>>, vector<1x64xf32>
    %cst = arith.constant dense<0.000000e+00> : vector<8x64xf32>
    %3 = tpu.matmul %0, %1, %cst {dimension_numbers = #tpu.dot_dimension_numbers<[1], [0], [0], [1], [0, 0, 1, 1], [], []>} : vector<8x32xf32>, vector<32x64xf32>, vector<8x64xf32> -> vector<8x64xf32>
    %4 = vector.broadcast %2 : vector<1x64xf32> to vector<8x64xf32>
    %5 = arith.addf %3, %4 : vector<8x64xf32>
    %cst_5 = arith.constant 0.000000e+00 : f32
    %6 = vector.broadcast %cst_5 : f32 to vector<8x64xf32>
    %7 = arith.maximumf %5, %6 : vector<8x64xf32>
    %c0_6 = arith.constant 0 : index
    %c0_7 = arith.constant 0 : index
    %8 = vector.load %arg4[%c0_6, %c0_7] : memref<64x128xf32, #tpu.memory_space<vmem>>, vector<64x128xf32>
    %c0_8 = arith.constant 0 : index
    %c0_9 = arith.constant 0 : index
    %9 = vector.load %arg5[%c0_8, %c0_9] : memref<1x128xf32, #tpu.memory_space<vmem>>, vector<1x128xf32>
    %cst_10 = arith.constant dense<0.000000e+00> : vector<8x128xf32>
    %10 = tpu.matmul %7, %8, %cst_10 {dimension_numbers = #tpu.dot_dimension_numbers<[1], [0], [0], [1], [0, 0, 1, 1], [], []>} : vector<8x64xf32>, vector<64x128xf32>, vector<8x128xf32> -> vector<8x128xf32>
    %11 = vector.broadcast %9 : vector<1x128xf32> to vector<8x128xf32>
    %12 = arith.addf %10, %11 : vector<8x128xf32>
    %cst_11 = arith.constant 0.000000e+00 : f32
    %13 = vector.broadcast %cst_11 : f32 to vector<8x128xf32>
    %14 = arith.maximumf %12, %13 : vector<8x128xf32>
    %c0_12 = arith.constant 0 : index
    %c0_13 = arith.constant 0 : index
    %15 = vector.load %arg6[%c0_12, %c0_13] : memref<8x128xf32, #tpu.memory_space<vmem>>, vector<8x128xf32>
    tpu.vector_store %arg6[%c0_12, %c0_13], %14 {strides = array<i32>} : memref<8x128xf32, #tpu.memory_space<vmem>>, vector<8x128xf32>,
    return
  }
  func.func @transform_0(%arg0: i32) -> (i32, i32) {
    %c0_i32 = arith.constant 0 : i32
    %c0_i32_0 = arith.constant 0 : i32
    return %arg0, %c0_i32 : i32, i32
  }
  func.func @transform_1(%arg0: i32) -> (i32, i32) {
    %c0_i32 = arith.constant 0 : i32
    %c0_i32_0 = arith.constant 0 : i32
    %c0_i32_1 = arith.constant 0 : i32
    return %c0_i32, %c0_i32_0 : i32, i32
  }
  func.func @transform_2(%arg0: i32) -> (i32, i32) {
    %c0_i32 = arith.constant 0 : i32
    %c0_i32_0 = arith.constant 0 : i32
    %c0_i32_1 = arith.constant 0 : i32
    return %c0_i32, %c0_i32_0 : i32, i32
  }
  func.func @transform_3(%arg0: i32) -> (i32, i32) {
    %c0_i32 = arith.constant 0 : i32
    %c0_i32_0 = arith.constant 0 : i32
    %c0_i32_1 = arith.constant 0 : i32
    return %c0_i32, %c0_i32_0 : i32, i32
  }
  func.func @transform_4(%arg0: i32) -> (i32, i32) {
    %c0_i32 = arith.constant 0 : i32
    %c0_i32_0 = arith.constant 0 : i32
    %c0_i32_1 = arith.constant 0 : i32
    return %c0_i32, %c0_i32_0 : i32, i32
  }
  func.func @transform_5(%arg0: i32) -> (i32, i32) {
    %c0_i32 = arith.constant 0 : i32
    %c0_i32_0 = arith.constant 0 : i32
    return %arg0, %c0_i32 : i32, i32
  }
}

</mosaic_0001>

<bundles_post_ra>
// kernel: enhanced_base_model_forward.1
= control target key start
LH: loop header
LB: loop body
LE: loop exit
PB: predicated region body
PF: predicated region fallthrough
CT: control target
= control target key end

     0   :  { %10 = vsyncpa [#allocation3], 0  ;;  %s452_s0 = inlined_call_operand.hbm [shape: f32[8,32], index: 0, kind: input, shape index: {}]   ;;  %s453_s1 = inlined_call_operand.hbm [shape: f32[32,64], index: 1, kind: input, shape index: {}]   ;;  %s454_s2 = inlined_call_operand.vmem [shape: f32[1,64], index: 2, kind: input, shape index: {}]   ;;  %s455_s3 = inlined_call_operand.hbm [shape: f32[64,128], index: 3, kind: input, shape index: {}]   ;;  %s456_s4 = inlined_call_operand.vmem [shape: f32[1,128], index: 4, kind: input, shape index: {}]   ;;  %s457_s5 = inlined_call_operand.hbm [shape: f32[8,128], index: 5, kind: output, shape index: {}]  }
   0x1   :  { %11 = vsyncpa [#allocation6], 0 }
   0x2   :  { %12 = vsyncpa [#allocation4], 0  ;;  %s396_s18 = smov [#allocation5]  }
   0x3   :  { %s28_s19 = sshll.u32 %s396_s18, 4  ;;  %s29_s19 = int_to_ptr.vmem [resolvable:$true] %s28_s19 }
   0x4   :  { %s318_s20 = scalar_lea.vmem %s29_s19, 512  ;;  %p323_p1 = scmp.lt.s32.totalorder %s29_s19, %s29_s19 }
   0x5   :  { %p319_p0 = scmp.ne.s32.totalorder %s29_s19, %s318_s20  ;;  %p324_p2 = scmp.lt.s32.totalorder %s318_s20, %s318_s20 }
   0x7   :  { %p325_p3 = por %p324_p2, %p323_p1 }
   0x9   :  { %p326_p4 = pnand %p325_p3, %p319_p0 }
   0xb   :  { %329 = shalt.err (!%p326_p4)
}
   0xc   :  { %s397_s21 = smov 128   ;;  %s398_s22 = smov 8  }
   0xd   :  { %34 = dma.hbm_to_vmem [thread:$0]  %s453_s1, 512, %s29_s19, [#allocation6], %s397_s21, %s397_s21, %s398_s22  }
   0xe   :  { %s399_s25 = smov [#allocation2]   ;;  %s400_s27 = smov [#allocation7]  }
   0xf   :  { %s19_s26 = sshll.u32 %s399_s25, 4  ;;  %s42_s28 = sshll.u32 %s400_s27, 4  ;;  %s20_s26 = int_to_ptr.vmem [resolvable:$true] %s19_s26  ;;  %s43_s28 = int_to_ptr.vmem [resolvable:$true] %s42_s28 }
  0x10   :  { %s338_s29 = scalar_lea.vmem %s20_s26, 128  ;;  %p343_p6 = scmp.lt.s32.totalorder %s20_s26, %s20_s26 }
  0x11   :  { %p339_p5 = scmp.ne.s32.totalorder %s20_s26, %s338_s29  ;;  %p344_p7 = scmp.lt.s32.totalorder %s338_s29, %s338_s29 }
  0x13   :  { %p345_p8 = por %p344_p7, %p343_p6 }
  0x15   :  { %p346_p9 = pnand %p345_p8, %p339_p5 }
  0x17   :  { %349 = shalt.err (!%p346_p9)
}
  0x18   :  { %22 = dma.hbm_to_vmem [thread:$0]  %s452_s0, 128, %s20_s26, [#allocation3]  }
  0x19   :  { %s358_s7 = scalar_lea.vmem %s43_s28, 1024  ;;  %p363_p11 = scmp.lt.s32.totalorder %s43_s28, %s43_s28 }
  0x1a   :  { %p359_p10 = scmp.ne.s32.totalorder %s43_s28, %s358_s7  ;;  %p364_p12 = scmp.lt.s32.totalorder %s358_s7, %s358_s7 }
  0x1c   :  { %p365_p13 = por %p364_p12, %p363_p11 }
  0x1e   :  { %p366_p0 = pnand %p365_p13, %p359_p10 }
  0x20   :  { %369 = shalt.err (!%p366_p0)
}
  0x21   :  { %48 = dma.hbm_to_vmem [thread:$0]  %s455_s3, 1024, %s43_s28, [#allocation6], %s397_s21, %s397_s21, %s398_s22  }
  0x22   :  { %390 = dma.done.wait [#allocation3], 128  }
  0x23   :  { %391 = vsyncadd [#allocation3], 4294967168 }
  0x24   :  { %392 = dma.done.wait [#allocation6], 1536  }
  0x25   :  { %393 = vsyncadd [#allocation6], 4294965760  ;;  %v401_v0 = vmov 0.0   ;;  %vm402_vm0 = vmmov 0   ;;  %v64_v1 = vld [vmem:[#allocation5 + $0x18] sm:$0xff]  ;;  %v63_v2 = vld [vmem:[#allocation5 + $0x10] sm:$0xff] }
  0x26   :  { %272 = vmatprep.subr.mxu0 %v401_v0  ;;  %280 = vmatprep.mubr.msk.f32.mxu0 %vm402_vm0, %v401_v0  ;;  %v154_v3 = vld [vmem:[#allocation7 + $0x38] sm:$0xff]  ;;  %v62_v4 = vld [vmem:[#allocation5 + $0x8] sm:$0xff]  ;;  %v153_v5 = vld [vmem:[#allocation7 + $0x30] sm:$0xff]  ;;  %vm72_vm1 = vcmask 261120   ;;  %vm162_vm2 = vcmask 523264   ;;  %s403_s11 = smov [#allocation8]  }
  0x27   :  { %283 = vmatprep.subr.mxu1 %v401_v0  ;;  %299 = vmatprep.mubr.msk.f32.mxu1 %vm402_vm0, %v401_v0  ;;  %v152_v6 = vld [vmem:[#allocation7 + $0x28] sm:$0xff]  ;;  %v61_v7 = vld [vmem:[#allocation5] sm:$0xff]  ;;  %v60_v8 = vld [vmem:[#allocation2] sm:$0xff]  ;;  %s244_s12 = sshll.u32 %s403_s11, 4  ;;  %s245_s12 = int_to_ptr.vmem [resolvable:$true] %s244_s12 }
  0x28   :  { %273 = vmatpush3.msra.mxu0 %v64_v1  ;;  %284 = vmatpush3.msra.mxu1 %v154_v3  ;;  %v151_v9 = vld [vmem:[#allocation7 + $0x20] sm:$0xff]  ;;  %v150_v10 = vld [vmem:[#allocation7 + $0x18] sm:$0xff]  ;;  %v149_v11 = vld [vmem:[#allocation7 + $0x10] sm:$0xff]  ;;  %s370_s13 = scalar_lea.vmem %s245_s12, 128  ;;  %p375_p2 = scmp.lt.s32.totalorder %s245_s12, %s245_s12 }
  0x29   :  { %274 = vmatprep.subr.mxu0 %v401_v0  ;;  %285 = vmatprep.subr.mxu1 %v401_v0  ;;  %v148_v12 = vld [vmem:[#allocation7 + $0x8] sm:$0xff]  ;;  %v147_v13 = vld [vmem:[#allocation7] sm:$0xff]  ;;  %v254_v14 = vld [vmem:[%s454_s2] ss:$0 sm:$0xff]  ;;  %p371_p1 = scmp.ne.s32.totalorder %s245_s12, %s370_s13  ;;  %p376_p3 = scmp.lt.s32.totalorder %s370_s13, %s370_s13 }
  0x2a   :  { %275 = vmatpush3.msra.mxu0 %v63_v2  ;;  %286 = vmatpush3.msra.mxu1 %v153_v5  ;;  %v256_v19 = vld [vmem:[%s456_s4] ss:$0 sm:$0xff] }
  0x2b   :  { %276 = vmatprep.subr.mxu0 %v401_v0  ;;  %287 = vmatprep.subr.mxu1 %v401_v0  ;;  %p377_p4 = por %p376_p3, %p375_p2 }
  0x2c   :  { %277 = vmatpush3.msra.mxu0 %v62_v4  ;;  %288 = vmatpush3.msra.mxu1 %v152_v6 }
  0x2d   :  { %278 = vmatprep.subr.mxu0 %v401_v0  ;;  %289 = vmatprep.subr.mxu1 %v401_v0  ;;  %p378_p5 = pnand %p377_p4, %p371_p1 }
  0x2e   :  { %279 = vmatpush3.msra.mxu0 %v61_v7  ;;  %290 = vmatpush3.msra.mxu1 %v151_v9 }
  0x2f   :  { %281 = vmatmul.mubr.msk.f32.vlgmr.msra.gmra.mxu0 %vm72_vm1, %v60_v8  ;;  %291 = vmatprep.subr.mxu1 %v401_v0 }
  0x30   :  { %292 = vmatpush3.msra.mxu1 %v150_v10 }
  0x31   :  { %293 = vmatprep.subr.mxu1 %v401_v0 }
  0x32   :  { %294 = vmatpush3.msra.mxu1 %v149_v11 }
  0x33   :  { %295 = vmatprep.subr.mxu1 %v401_v0 }
  0x34   :  { %296 = vmatpush3.msra.mxu1 %v148_v12 }
  0x35   :  { %297 = vmatprep.subr.mxu1 %v401_v0 }
  0x36   :  { %298 = vmatpush3.msra.mxu1 %v147_v13 }
  0xef   :  { %v142_v15 = vpop.f32.mrf.mxu0 }
  0xf0   :  { %v143_v16 = vadd.f32 %v254_v14, %v142_v15 }
  0xf1   :  { %v282_v17 = vpop.f32.mrf.mxu0 }
  0xf2   :  { %v146_v18 = vmax.f32 %v143_v16, 0.0 }
  0xf4   :  { %300 = vmatmul.mubr.msk.f32.vlgmr.msra.gmra.mxu1 %vm162_vm2, %v146_v18 }
 0x1b4   :  { %v232_v20 = vpop.f32.mrf.mxu1 }
 0x1b5   :  { %v233_v21 = vadd.f32 %v256_v19, %v232_v20 }
 0x1b6   :  { %v301_v22 = vpop.f32.mrf.mxu1 }
 0x1b7   :  { %v236_v23 = vmax.f32 %v233_v21, 0.0 }
 0x1b9   :  { %237 = vst [vmem:[#allocation8] sm:$0xff] %v236_v23 }
 0x1ba   :  { %381 = shalt.err (!%p378_p5)
}
 0x1bb   :  { %247 = dma.vmem_to_hbm [thread:$0]  %s245_s12, 128, %s457_s5, [#allocation4]  }
 0x1bc   :  { %394 = dma.done.wait [#allocation4], 128  }
 0x1bd   :  { %395 = vsyncadd [#allocation4], 4294967168 }
 0x1be   :  { %251 = vsyncpa [#allocation3], 1 }
 0x1bf   :  { %252 = vsyncpa [#allocation6], 1 }
 0x1c0   :  { %253 = vsyncpa [#allocation4], 1 }

</bundles_post_ra>
